<compile_context>
chip_gen: v7x
topology: tpu7x:2x2x1
jax: 0.10.0
libtpu: 0.0.40
codegen_flags: <defaults>
</compile_context>

<pallas_src>
import functools

import jax
import jax.numpy as jnp
import numpy as np
from jax.experimental import pallas as pl
from jax.experimental.pallas import tpu as pltpu


# -----------------------------------------------------------------------------
# Pallas kernel: one grid step processes Nb batch samples.
# -----------------------------------------------------------------------------
def _odconv_kernel(x_ref, hmat_ref, cmat_ref, misc_ref, out_ref, *,
                   C1, C2, HID, K, KK):
    # x_ref    : (Nb, C1, HW)            lane-dense input slab
    # hmat_ref : (C1+2+C2+KK+K, HID)     [fc_w^T ; bnfc_scale ; bnfc_shift ; wf ; ws ; ww]
    # cmat_ref : (HID+1+K*C2, C1)        [wc^T ; bc ; wK[0] ; ... ; wK[K-1]]
    # misc_ref : (C2+KK+K + 3*C2, K)     [head-bias col | biasT | bn2_scale | bn2_shift]
    # out_ref  : (Nb, C2, HW)
    Nb = x_ref.shape[0]
    HW = x_ref.shape[2]
    ROWS = C2 + KK + K                       # rows of the f/s/w head block

    x = x_ref[...].astype(jnp.float32)       # (Nb, C1, HW)

    # ---- attention branch, vectorized over the Nb samples (VPU/XLU only) -----
    pooled = jnp.sum(x, axis=2) * (1.0 / HW)                       # (Nb, C1)  GAP

    fcwT   = hmat_ref[0:C1, :]                                     # (C1, HID)
    bnfc_s = hmat_ref[C1:C1 + 1, :]                                # (1, HID)
    bnfc_b = hmat_ref[C1 + 1:C1 + 2, :]                            # (1, HID)
    heads  = hmat_ref[C1 + 2:C1 + 2 + ROWS, :]                     # (ROWS, HID)

    # h = ReLU(BN_fc(fc(pooled)))                                  # (Nb, HID)
    h = jnp.sum(pooled[:, :, None] * fcwT[None, :, :], axis=1)
    h = jnp.maximum(h * bnfc_s + bnfc_b, 0.0)

    # filter / spatial / kernel heads, one column per sample        (ROWS, Nb)
    hb = misc_ref[0:ROWS, 0:1]                                     # packed biases
    aT = jnp.sum(heads[:, None, :] * h[None, :, :], axis=2) + hb

    attn_f = jax.nn.sigmoid(aT[0:C2, :])                           # (C2, Nb)
    attn_s = jax.nn.sigmoid(aT[C2:C2 + KK, :])                     # (KK, Nb), KK == 1
    wl = aT[C2 + KK:ROWS, :]                                       # (K, Nb)
    wl = wl - jnp.max(wl, axis=0, keepdims=True)
    we = jnp.exp(wl)
    attn_w = we / jnp.sum(we, axis=0, keepdims=True)               # softmax over K

    # channel head computed directly as rows -> folds into dynw columns
    wcT = cmat_ref[0:HID, :]                                       # (HID, C1)
    bc  = cmat_ref[HID:HID + 1, :]                                 # (1, C1)
    attn_c = jax.nn.sigmoid(
        jnp.sum(h[:, :, None] * wcT[None, :, :], axis=1) + bc)     # (Nb, C1)

    biasT = misc_ref[ROWS:ROWS + C2, 0:K]                          # (C2, K)
    bn2_s = misc_ref[ROWS + C2:ROWS + 2 * C2, 0:1]                 # (C2, 1)
    bn2_b = misc_ref[ROWS + 2 * C2:ROWS + 3 * C2, 0:1]             # (C2, 1)

    # ---- per-sample dynamic 1x1 conv, BN folded into the tiny weight + SiLU --
    for n in range(Nb):
        aw = attn_w[:, n:n + 1]                                    # (K, 1)
        wbar = cmat_ref[HID + 1:HID + 1 + C2, :] * aw[0:1, 0:1]    # (C2, C1)
        dynb = biasT[:, 0:1] * aw[0:1, 0:1]                        # (C2, 1)
        for t in range(1, K):
            base = HID + 1 + t * C2
            a_t = aw[t:t + 1, 0:1]
            wbar = wbar + cmat_ref[base:base + C2, :] * a_t
            dynb = dynb + biasT[:, t:t + 1] * a_t

        # attn_f, attn_s and the output-BN scale fold into the weight rows,
        # attn_c into its columns, the BN shift into the bias: nothing full-slab
        # is left in the epilogue besides the SiLU itself.
        row_scale = attn_f[:, n:n + 1] * attn_s[0:1, n:n + 1] * bn2_s   # (C2, 1)
        dynw = wbar * row_scale * attn_c[n:n + 1, :]                    # (C2, C1)
        shift = dynb * bn2_s + bn2_b                                    # (C2, 1)

        xn = x[n]                                                       # (C1, HW)
        if C1 <= 8:
            # contraction depth <= 8: unrolled VPU broadcast-FMA instead of a
            # >95%-idle MXU push/pop (fastest on v5e, fine on v6e/v7x too).
            y = dynw[:, 0:1] * xn[0:1, :] + shift
            for i in range(1, C1):
                y = y + dynw[:, i:i + 1] * xn[i:i + 1, :]
        else:
            y = jnp.dot(dynw, xn, preferred_element_type=jnp.float32) + shift
        out_ref[n] = (y * jax.nn.sigmoid(y)).astype(out_ref.dtype)   # SiLU, 256-lane store


# -----------------------------------------------------------------------------
# Wrapper: NCHW in / NCHW out.  grid = (N // Nb,), parameters as 3 packed slabs.
# -----------------------------------------------------------------------------
def _pick_block_n(n, max_nb=8):
    nb = 1
    for cand in range(2, min(n, max_nb) + 1):
        if n % cand == 0:
            nb = cand
    return nb


def odconv3rd_forward(x_nchw, hmat, cmat, misc, *, c2, K, kk=1, block_n=None):
    N, C1, H, W = x_nchw.shape
    HW = H * W
    HID = hmat.shape[1]
    Nb = _pick_block_n(N) if block_n is None else block_n
    assert N % Nb == 0, "block_n must divide the batch size"

    x_flat = x_nchw.reshape(N, C1, HW)      # NCHW -> lane-dense slab (pure reshape)

    kernel = functools.partial(_odconv_kernel, C1=C1, C2=c2, HID=HID, K=K, KK=kk)
    rep2 = lambda i: (0, 0)

    out_flat = pl.pallas_call(
        kernel,
        out_shape=jax.ShapeDtypeStruct((N, c2, HW), jnp.float32),
        grid_spec=pltpu.PrefetchScalarGridSpec(
            num_scalar_prefetch=0,
            grid=(N // Nb,),
            in_specs=[
                pl.BlockSpec((Nb, C1, HW), lambda i: (i, 0, 0)),
                # constant-index parameter slabs: fetched once, stay resident.
                pl.BlockSpec(hmat.shape, rep2),
                pl.BlockSpec(cmat.shape, rep2),
                pl.BlockSpec(misc.shape, rep2),
            ],
            out_specs=pl.BlockSpec((Nb, c2, HW), lambda i: (i, 0, 0)),
        ),
        compiler_params=pltpu.CompilerParams(
            dimension_semantics=("parallel",)),
    )(x_flat, hmat, cmat, misc)

    return out_flat.reshape(N, c2, H, W)


# -----------------------------------------------------------------------------
# Parameter packing: 3 slabs (lane dims HID / C1 / K).
# -----------------------------------------------------------------------------
def pack_params(p):
    hid, c1 = p["fc_w"].shape
    c2 = p["wf"].shape[0]
    kk = p["ws"].shape[0]
    K = p["ww"].shape[0]

    hmat = jnp.concatenate([
        p["fc_w"].T,                       # (c1, hid)
        p["bnfc_s"][None, :],              # (1, hid)
        p["bnfc_b"][None, :],              # (1, hid)
        p["wf"],                           # (c2, hid)
        p["ws"],                           # (kk, hid)
        p["ww"],                           # (K, hid)
    ], axis=0)

    cmat = jnp.concatenate([
        p["wc"].T,                         # (hid, c1)  channel head, row layout
        p["bc"][None, :],                  # (1, c1)
        p["wK"].reshape(K * c2, c1),       # (K*c2, c1) base dynamic-conv kernels
    ], axis=0)

    head_bias = jnp.concatenate([p["bf"], p["bs"], p["bw"]])[:, None]  # (c2+kk+K, 1)
    pad = ((0, 0), (0, K - 1))
    misc = jnp.concatenate([
        jnp.pad(head_bias, pad),
        p["bias"].T,                       # (c2, K)
        jnp.pad(p["bn2_s"][:, None], pad),
        jnp.pad(p["bn2_b"][:, None], pad),
    ], axis=0)
    return hmat, cmat, misc


# -----------------------------------------------------------------------------
# Deterministic parameter construction (eval-mode BN folded into scale/shift).
# -----------------------------------------------------------------------------
def make_params(key, c1, c2, K, k=1, r=1.0 / 16.0, eps=1e-5):
    assert k == 1, "only the ODConv_3rd default k=1 (1x1 dynamic conv) is implemented"
    hid = max(int(c1 * r), 16)
    kk = k * k
    keys = iter(jax.random.split(key, 9))

    def bn_fold(kkey, c):
        k1, k2, k3, k4 = jax.random.split(kkey, 4)
        gamma = 1.0 + 0.1 * jax.random.normal(k1, (c,), jnp.float32)
        beta = 0.1 * jax.random.normal(k2, (c,), jnp.float32)
        mean = 0.1 * jax.random.normal(k3, (c,), jnp.float32)
        var = 0.5 + jnp.abs(jax.random.normal(k4, (c,), jnp.float32))
        scale = gamma / jnp.sqrt(var + eps)
        return scale, beta - mean * scale

    def linear(kkey, out_d, in_d, std=0.3):
        kw, kb = jax.random.split(kkey)
        return (std * jax.random.normal(kw, (out_d, in_d), jnp.float32),
                std * jax.random.normal(kb, (out_d,), jnp.float32))

    p = {}
    p["fc_w"] = 0.3 * jax.random.normal(next(keys), (hid, c1), jnp.float32)
    p["bnfc_s"], p["bnfc_b"] = bn_fold(next(keys), hid)     # attention BN (folded)
    p["wf"], p["bf"] = linear(next(keys), c2, hid)          # filter head
    p["ws"], p["bs"] = linear(next(keys), kk, hid)          # spatial head (k=1)
    p["wc"], p["bc"] = linear(next(keys), c1, hid)          # channel head
    p["ww"], p["bw"] = linear(next(keys), K, hid)           # kernel head
    fan_out = k * k * c2
    p["wK"] = jnp.sqrt(2.0 / fan_out) * jax.random.normal(
        next(keys), (K, c2, c1), jnp.float32)                # (K, c2, c1)
    p["bias"] = 0.1 * jax.random.normal(next(keys), (K, c2), jnp.float32)
    p["bn2_s"], p["bn2_b"] = bn_fold(next(keys), c2)         # output BN (folded)
    return p


# -----------------------------------------------------------------------------
# Plain-JAX reference (same folded parameters) for a silent correctness check.
# -----------------------------------------------------------------------------
def odconv3rd_reference(x, p):
    pooled = jnp.mean(x, axis=(2, 3))                               # (N, C1)
    h = pooled @ p["fc_w"].T                                        # (N, HID)
    h = jnp.maximum(h * p["bnfc_s"][None, :] + p["bnfc_b"][None, :], 0.0)
    attn_f = jax.nn.sigmoid(h @ p["wf"].T + p["bf"][None, :])       # (N, C2)
    attn_s = jax.nn.sigmoid(h @ p["ws"].T + p["bs"][None, :])       # (N, 1)
    attn_c = jax.nn.sigmoid(h @ p["wc"].T + p["bc"][None, :])       # (N, C1)
    attn_w = jax.nn.softmax(h @ p["ww"].T + p["bw"][None, :], -1)   # (N, K)

    wbar = jnp.einsum("nk,koi->noi", attn_w, p["wK"])               # (N, C2, C1)
    dynw = wbar * attn_f[:, :, None] * attn_c[:, None, :] * attn_s[:, :, None]
    dynb = attn_w @ p["bias"]                                       # (N, C2)

    y = jnp.einsum("noi,nihw->nohw", dynw, x) + dynb[:, :, None, None]
    z = y * p["bn2_s"][None, :, None, None] + p["bn2_b"][None, :, None, None]
    return z * jax.nn.sigmoid(z)


if __name__ == "__main__":
    # Small shapes consistent with the module: batch=2, c1=4, c2=8, 16x16 spatial.
    N, C1, C2, H, W = 2, 4, 8, 16, 16
    key = jax.random.PRNGKey(0)

    for K in (1, 2):   # kerNums: module default (1) plus K=2 to exercise the softmax path
        kx, kp = jax.random.split(jax.random.fold_in(key, K))
        x = jax.random.normal(kx, (N, C1, H, W), jnp.float32)
        p = make_params(kp, C1, C2, K)
        hmat, cmat, misc = pack_params(p)

        out = jax.block_until_ready(
            odconv3rd_forward(x, hmat, cmat, misc, c2=C2, K=K))
        ref = jax.block_until_ready(odconv3rd_reference(x, p))

        assert out.shape == (N, C2, H, W)
        assert np.allclose(np.asarray(out), np.asarray(ref), rtol=1e-4, atol=1e-4), (
            f"mismatch vs reference for K={K}: max abs err "
            f"{float(jnp.max(jnp.abs(out - ref)))}")

    print("KERNEL_OK")
</pallas_src>

<mosaic_0001>
module attributes {stable_mosaic.version = 11 : i64} {
  func.func @_odconv_kernel(%arg0: i32, %arg1: memref<2x4x256xf32, #tpu.memory_space<vmem>>, %arg2: memref<16x16xf32, #tpu.memory_space<vmem>>, %arg3: memref<25x4xf32, #tpu.memory_space<vmem>>, %arg4: memref<34x1xf32, #tpu.memory_space<vmem>>, %arg5: memref<2x8x256xf32, #tpu.memory_space<vmem>>) attributes {dimension_semantics = [#tpu.dimension_semantics<parallel>], iteration_bounds = array<i64: 1>, scalar_prefetch = 0 : i64, scratch_operands = 0 : i64, tpu.core_type = #tpu.core_type<tc>, window_params = [{transform_indices = @transform_0, window_bounds = array<i64: 2, 4, 256>}, {pipeline_mode = #tpu.pipeline_mode<synchronous>, transform_indices = @transform_1, window_bounds = array<i64: 16, 16>}, {pipeline_mode = #tpu.pipeline_mode<synchronous>, transform_indices = @transform_2, window_bounds = array<i64: 25, 4>}, {pipeline_mode = #tpu.pipeline_mode<synchronous>, transform_indices = @transform_3, window_bounds = array<i64: 34, 1>}, {transform_indices = @transform_4, window_bounds = array<i64: 2, 8, 256>}]} {
    %c0 = arith.constant 0 : index
    %c0_0 = arith.constant 0 : index
    %c0_1 = arith.constant 0 : index
    %0 = vector.load %arg1[%c0, %c0_0, %c0_1] : memref<2x4x256xf32, #tpu.memory_space<vmem>>, vector<2x4x256xf32>
    %cst = arith.constant dense<0.000000e+00> : vector<2x4xf32>
    %1 = vector.multi_reduction <add>, %0, %cst [2] : vector<2x4x256xf32> to vector<2x4xf32>
    %cst_2 = arith.constant 3.906250e-03 : f32
    %2 = vector.broadcast %cst_2 : f32 to vector<2x4xf32>
    %3 = arith.mulf %1, %2 : vector<2x4xf32>
    %c0_3 = arith.constant 0 : index
    %c0_4 = arith.constant 0 : index
    %4 = vector.load %arg2[%c0_3, %c0_4] : memref<16x16xf32, #tpu.memory_space<vmem>>, vector<4x16xf32>
    %c4 = arith.constant 4 : index
    %c0_5 = arith.constant 0 : index
    %5 = vector.load %arg2[%c4, %c0_5] : memref<16x16xf32, #tpu.memory_space<vmem>>, vector<1x16xf32>
    %c5 = arith.constant 5 : index
    %c0_6 = arith.constant 0 : index
    %6 = vector.load %arg2[%c5, %c0_6] : memref<16x16xf32, #tpu.memory_space<vmem>>, vector<1x16xf32>
    %c6 = arith.constant 6 : index
    %c0_7 = arith.constant 0 : index
    %7 = vector.load %arg2[%c6, %c0_7] : memref<16x16xf32, #tpu.memory_space<vmem>>, vector<10x16xf32>
    %8 = vector.shape_cast %3 : vector<2x4xf32> to vector<2x4x1xf32>
    %9 = vector.shape_cast %4 : vector<4x16xf32> to vector<1x4x16xf32>
    %10 = vector.broadcast %8 : vector<2x4x1xf32> to vector<2x4x16xf32>
    %11 = vector.broadcast %9 : vector<1x4x16xf32> to vector<2x4x16xf32>
    %12 = arith.mulf %10, %11 : vector<2x4x16xf32>
    %cst_8 = arith.constant dense<0.000000e+00> : vector<2x16xf32>
    %13 = vector.multi_reduction <add>, %12, %cst_8 [1] : vector<2x4x16xf32> to vector<2x16xf32>
    %14 = vector.broadcast %5 : vector<1x16xf32> to vector<2x16xf32>
    %15 = arith.mulf %13, %14 : vector<2x16xf32>
    %16 = vector.broadcast %6 : vector<1x16xf32> to vector<2x16xf32>
    %17 = arith.addf %15, %16 : vector<2x16xf32>
    %cst_9 = arith.constant 0.000000e+00 : f32
    %18 = vector.broadcast %cst_9 : f32 to vector<2x16xf32>
    %19 = arith.maximumf %17, %18 : vector<2x16xf32>
    %c0_10 = arith.constant 0 : index
    %c0_11 = arith.constant 0 : index
    %20 = vector.load %arg4[%c0_10, %c0_11] : memref<34x1xf32, #tpu.memory_space<vmem>>, vector<10x1xf32>
    %21 = vector.shape_cast %7 : vector<10x16xf32> to vector<10x1x16xf32>
    %22 = vector.shape_cast %19 : vector<2x16xf32> to vector<1x2x16xf32>
    %23 = vector.broadcast %21 : vector<10x1x16xf32> to vector<10x2x16xf32>
    %24 = vector.broadcast %22 : vector<1x2x16xf32> to vector<10x2x16xf32>
    %25 = arith.mulf %23, %24 : vector<10x2x16xf32>
    %cst_12 = arith.constant dense<0.000000e+00> : vector<10x2xf32>
    %26 = vector.multi_reduction <add>, %25, %cst_12 [2] : vector<10x2x16xf32> to vector<10x2xf32>
    %27 = vector.broadcast %20 : vector<10x1xf32> to vector<10x2xf32>
    %28 = arith.addf %26, %27 : vector<10x2xf32>
    %29 = vector.extract_strided_slice %28 {offsets = [0, 0], sizes = [8, 2], strides = [1, 1]} : vector<10x2xf32> to vector<8x2xf32>
    %30 = arith.negf %29 : vector<8x2xf32>
    %31 = math.exp %30 : vector<8x2xf32>
    %cst_13 = arith.constant 1.000000e+00 : f32
    %32 = vector.broadcast %cst_13 : f32 to vector<8x2xf32>
    %33 = arith.addf %32, %31 : vector<8x2xf32>
    %34 = arith.divf %32, %33 : vector<8x2xf32>
    %35 = vector.extract_strided_slice %28 {offsets = [8, 0], sizes = [1, 2], strides = [1, 1]} : vector<10x2xf32> to vector<1x2xf32>
    %36 = arith.negf %35 : vector<1x2xf32>
    %37 = math.exp %36 : vector<1x2xf32>
    %cst_14 = arith.constant 1.000000e+00 : f32
    %38 = vector.broadcast %cst_14 : f32 to vector<1x2xf32>
    %39 = arith.addf %38, %37 : vector<1x2xf32>
    %40 = arith.divf %38, %39 : vector<1x2xf32>
    %41 = vector.extract_strided_slice %28 {offsets = [9, 0], sizes = [1, 2], strides = [1, 1]} : vector<10x2xf32> to vector<1x2xf32>
    %cst_15 = arith.constant dense<0xFF800000> : vector<2xf32>
    %42 = vector.multi_reduction <maximumf>, %41, %cst_15 [0] : vector<1x2xf32> to vector<2xf32>
    %43 = vector.shape_cast %42 : vector<2xf32> to vector<1x2xf32>
    %44 = arith.subf %41, %43 : vector<1x2xf32>
    %45 = math.exp %44 : vector<1x2xf32>
    %cst_16 = arith.constant dense<0.000000e+00> : vector<2xf32>
    %46 = vector.multi_reduction <add>, %45, %cst_16 [0] : vector<1x2xf32> to vector<2xf32>
    %47 = vector.shape_cast %46 : vector<2xf32> to vector<1x2xf32>
    %48 = arith.divf %45, %47 : vector<1x2xf32>
    %c0_17 = arith.constant 0 : index
    %c0_18 = arith.constant 0 : index
    %49 = vector.load %arg3[%c0_17, %c0_18] : memref<25x4xf32, #tpu.memory_space<vmem>>, vector<16x4xf32>
    %c16 = arith.constant 16 : index
    %c0_19 = arith.constant 0 : index
    %50 = vector.load %arg3[%c16, %c0_19] : memref<25x4xf32, #tpu.memory_space<vmem>>, vector<1x4xf32>
    %51 = vector.shape_cast %19 : vector<2x16xf32> to vector<2x16x1xf32>
    %52 = vector.shape_cast %49 : vector<16x4xf32> to vector<1x16x4xf32>
    %53 = vector.broadcast %51 : vector<2x16x1xf32> to vector<2x16x4xf32>
    %54 = vector.broadcast %52 : vector<1x16x4xf32> to vector<2x16x4xf32>
    %55 = arith.mulf %53, %54 : vector<2x16x4xf32>
    %cst_20 = arith.constant dense<0.000000e+00> : vector<2x4xf32>
    %56 = vector.multi_reduction <add>, %55, %cst_20 [1] : vector<2x16x4xf32> to vector<2x4xf32>
    %57 = vector.broadcast %50 : vector<1x4xf32> to vector<2x4xf32>
    %58 = arith.addf %56, %57 : vector<2x4xf32>
    %59 = arith.negf %58 : vector<2x4xf32>
    %60 = math.exp %59 : vector<2x4xf32>
    %cst_21 = arith.constant 1.000000e+00 : f32
    %61 = vector.broadcast %cst_21 : f32 to vector<2x4xf32>
    %62 = arith.addf %61, %60 : vector<2x4xf32>
    %63 = arith.divf %61, %62 : vector<2x4xf32>
    %c10 = arith.constant 10 : index
    %c0_22 = arith.constant 0 : index
    %64 = vector.load %arg4[%c10, %c0_22] : memref<34x1xf32, #tpu.memory_space<vmem>>, vector<8x1xf32>
    %c18 = arith.constant 18 : index
    %c0_23 = arith.constant 0 : index
    %65 = vector.load %arg4[%c18, %c0_23] : memref<34x1xf32, #tpu.memory_space<vmem>>, vector<8x1xf32>
    %c26 = arith.constant 26 : index
    %c0_24 = arith.constant 0 : index
    %66 = vector.load %arg4[%c26, %c0_24] : memref<34x1xf32, #tpu.memory_space<vmem>>, vector<8x1xf32>
    %67 = vector.extract_strided_slice %48 {offsets = [0, 0], sizes = [1, 1], strides = [1, 1]} : vector<1x2xf32> to vector<1x1xf32>
    %c17 = arith.constant 17 : index
    %c0_25 = arith.constant 0 : index
    %68 = vector.load %arg3[%c17, %c0_25] : memref<25x4xf32, #tpu.memory_space<vmem>>, vector<8x4xf32>
    %69 = vector.broadcast %67 : vector<1x1xf32> to vector<8x4xf32>
    %70 = arith.mulf %68, %69 : vector<8x4xf32>
    %71 = vector.broadcast %67 : vector<1x1xf32> to vector<8x1xf32>
    %72 = arith.mulf %64, %71 : vector<8x1xf32>
    %73 = vector.extract_strided_slice %34 {offsets = [0, 0], sizes = [8, 1], strides = [1, 1]} : vector<8x2xf32> to vector<8x1xf32>
    %74 = vector.extract_strided_slice %40 {offsets = [0, 0], sizes = [1, 1], strides = [1, 1]} : vector<1x2xf32> to vector<1x1xf32>
    %75 = vector.broadcast %74 : vector<1x1xf32> to vector<8x1xf32>
    %76 = arith.mulf %73, %75 : vector<8x1xf32>
    %77 = arith.mulf %76, %65 : vector<8x1xf32>
    %78 = vector.broadcast %77 : vector<8x1xf32> to vector<8x4xf32>
    %79 = arith.mulf %70, %78 : vector<8x4xf32>
    %80 = vector.extract_strided_slice %63 {offsets = [0, 0], sizes = [1, 4], strides = [1, 1]} : vector<2x4xf32> to vector<1x4xf32>
    %81 = vector.broadcast %80 : vector<1x4xf32> to vector<8x4xf32>
    %82 = arith.mulf %79, %81 : vector<8x4xf32>
    %83 = arith.mulf %72, %65 : vector<8x1xf32>
    %84 = arith.addf %83, %66 : vector<8x1xf32>
    %85 = vector.extract_strided_slice %0 {offsets = [0, 0, 0], sizes = [1, 4, 256], strides = [1, 1, 1]} : vector<2x4x256xf32> to vector<1x4x256xf32>
    %86 = vector.shape_cast %85 : vector<1x4x256xf32> to vector<4x256xf32>
    %87 = vector.extract_strided_slice %82 {offsets = [0, 0], sizes = [8, 1], strides = [1, 1]} : vector<8x4xf32> to vector<8x1xf32>
    %88 = vector.extract_strided_slice %86 {offsets = [0, 0], sizes = [1, 256], strides = [1, 1]} : vector<4x256xf32> to vector<1x256xf32>
    %89 = vector.broadcast %87 : vector<8x1xf32> to vector<8x256xf32>
    %90 = vector.broadcast %88 : vector<1x256xf32> to vector<8x256xf32>
    %91 = arith.mulf %89, %90 : vector<8x256xf32>
    %92 = vector.broadcast %84 : vector<8x1xf32> to vector<8x256xf32>
    %93 = arith.addf %91, %92 : vector<8x256xf32>
    %94 = vector.extract_strided_slice %82 {offsets = [0, 1], sizes = [8, 1], strides = [1, 1]} : vector<8x4xf32> to vector<8x1xf32>
    %95 = vector.extract_strided_slice %86 {offsets = [1, 0], sizes = [1, 256], strides = [1, 1]} : vector<4x256xf32> to vector<1x256xf32>
    %96 = vector.broadcast %94 : vector<8x1xf32> to vector<8x256xf32>
    %97 = vector.broadcast %95 : vector<1x256xf32> to vector<8x256xf32>
    %98 = arith.mulf %96, %97 : vector<8x256xf32>
    %99 = arith.addf %93, %98 : vector<8x256xf32>
    %100 = vector.extract_strided_slice %82 {offsets = [0, 2], sizes = [8, 1], strides = [1, 1]} : vector<8x4xf32> to vector<8x1xf32>
    %101 = vector.extract_strided_slice %86 {offsets = [2, 0], sizes = [1, 256], strides = [1, 1]} : vector<4x256xf32> to vector<1x256xf32>
    %102 = vector.broadcast %100 : vector<8x1xf32> to vector<8x256xf32>
    %103 = vector.broadcast %101 : vector<1x256xf32> to vector<8x256xf32>
    %104 = arith.mulf %102, %103 : vector<8x256xf32>
    %105 = arith.addf %99, %104 : vector<8x256xf32>
    %106 = vector.extract_strided_slice %82 {offsets = [0, 3], sizes = [8, 1], strides = [1, 1]} : vector<8x4xf32> to vector<8x1xf32>
    %107 = vector.extract_strided_slice %86 {offsets = [3, 0], sizes = [1, 256], strides = [1, 1]} : vector<4x256xf32> to vector<1x256xf32>
    %108 = vector.broadcast %106 : vector<8x1xf32> to vector<8x256xf32>
    %109 = vector.broadcast %107 : vector<1x256xf32> to vector<8x256xf32>
    %110 = arith.mulf %108, %109 : vector<8x256xf32>
    %111 = arith.addf %105, %110 : vector<8x256xf32>
    %112 = arith.negf %111 : vector<8x256xf32>
    %113 = math.exp %112 : vector<8x256xf32>
    %cst_26 = arith.constant 1.000000e+00 : f32
    %114 = vector.broadcast %cst_26 : f32 to vector<8x256xf32>
    %115 = arith.addf %114, %113 : vector<8x256xf32>
    %116 = arith.divf %114, %115 : vector<8x256xf32>
    %117 = arith.mulf %111, %116 : vector<8x256xf32>
    %c0_27 = arith.constant 0 : index
    %c0_28 = arith.constant 0 : index
    %c0_29 = arith.constant 0 : index
    %118 = vector.load %arg5[%c0_27, %c0_28, %c0_29] : memref<2x8x256xf32, #tpu.memory_space<vmem>>, vector<1x8x256xf32>
    %119 = vector.shape_cast %118 : vector<1x8x256xf32> to vector<8x256xf32>
    %120 = vector.shape_cast %117 : vector<8x256xf32> to vector<1x8x256xf32>
    tpu.vector_store %arg5[%c0_27, %c0_28, %c0_29], %120 {strides = array<i32>} : memref<2x8x256xf32, #tpu.memory_space<vmem>>, vector<1x8x256xf32>,
    %121 = vector.extract_strided_slice %48 {offsets = [0, 1], sizes = [1, 1], strides = [1, 1]} : vector<1x2xf32> to vector<1x1xf32>
    %c17_30 = arith.constant 17 : index
    %c0_31 = arith.constant 0 : index
    %122 = vector.load %arg3[%c17_30, %c0_31] : memref<25x4xf32, #tpu.memory_space<vmem>>, vector<8x4xf32>
    %123 = vector.broadcast %121 : vector<1x1xf32> to vector<8x4xf32>
    %124 = arith.mulf %122, %123 : vector<8x4xf32>
    %125 = vector.broadcast %121 : vector<1x1xf32> to vector<8x1xf32>
    %126 = arith.mulf %64, %125 : vector<8x1xf32>
    %127 = vector.extract_strided_slice %34 {offsets = [0, 1], sizes = [8, 1], strides = [1, 1]} : vector<8x2xf32> to vector<8x1xf32>
    %128 = vector.extract_strided_slice %40 {offsets = [0, 1], sizes = [1, 1], strides = [1, 1]} : vector<1x2xf32> to vector<1x1xf32>
    %129 = vector.broadcast %128 : vector<1x1xf32> to vector<8x1xf32>
    %130 = arith.mulf %127, %129 : vector<8x1xf32>
    %131 = arith.mulf %130, %65 : vector<8x1xf32>
    %132 = vector.broadcast %131 : vector<8x1xf32> to vector<8x4xf32>
    %133 = arith.mulf %124, %132 : vector<8x4xf32>
    %134 = vector.extract_strided_slice %63 {offsets = [1, 0], sizes = [1, 4], strides = [1, 1]} : vector<2x4xf32> to vector<1x4xf32>
    %135 = vector.broadcast %134 : vector<1x4xf32> to vector<8x4xf32>
    %136 = arith.mulf %133, %135 : vector<8x4xf32>
    %137 = arith.mulf %126, %65 : vector<8x1xf32>
    %138 = arith.addf %137, %66 : vector<8x1xf32>
    %139 = vector.extract_strided_slice %0 {offsets = [1, 0, 0], sizes = [1, 4, 256], strides = [1, 1, 1]} : vector<2x4x256xf32> to vector<1x4x256xf32>
    %140 = vector.shape_cast %139 : vector<1x4x256xf32> to vector<4x256xf32>
    %141 = vector.extract_strided_slice %136 {offsets = [0, 0], sizes = [8, 1], strides = [1, 1]} : vector<8x4xf32> to vector<8x1xf32>
    %142 = vector.extract_strided_slice %140 {offsets = [0, 0], sizes = [1, 256], strides = [1, 1]} : vector<4x256xf32> to vector<1x256xf32>
    %143 = vector.broadcast %141 : vector<8x1xf32> to vector<8x256xf32>
    %144 = vector.broadcast %142 : vector<1x256xf32> to vector<8x256xf32>
    %145 = arith.mulf %143, %144 : vector<8x256xf32>
    %146 = vector.broadcast %138 : vector<8x1xf32> to vector<8x256xf32>
    %147 = arith.addf %145, %146 : vector<8x256xf32>
    %148 = vector.extract_strided_slice %136 {offsets = [0, 1], sizes = [8, 1], strides = [1, 1]} : vector<8x4xf32> to vector<8x1xf32>
    %149 = vector.extract_strided_slice %140 {offsets = [1, 0], sizes = [1, 256], strides = [1, 1]} : vector<4x256xf32> to vector<1x256xf32>
    %150 = vector.broadcast %148 : vector<8x1xf32> to vector<8x256xf32>
    %151 = vector.broadcast %149 : vector<1x256xf32> to vector<8x256xf32>
    %152 = arith.mulf %150, %151 : vector<8x256xf32>
    %153 = arith.addf %147, %152 : vector<8x256xf32>
    %154 = vector.extract_strided_slice %136 {offsets = [0, 2], sizes = [8, 1], strides = [1, 1]} : vector<8x4xf32> to vector<8x1xf32>
    %155 = vector.extract_strided_slice %140 {offsets = [2, 0], sizes = [1, 256], strides = [1, 1]} : vector<4x256xf32> to vector<1x256xf32>
    %156 = vector.broadcast %154 : vector<8x1xf32> to vector<8x256xf32>
    %157 = vector.broadcast %155 : vector<1x256xf32> to vector<8x256xf32>
    %158 = arith.mulf %156, %157 : vector<8x256xf32>
    %159 = arith.addf %153, %158 : vector<8x256xf32>
    %160 = vector.extract_strided_slice %136 {offsets = [0, 3], sizes = [8, 1], strides = [1, 1]} : vector<8x4xf32> to vector<8x1xf32>
    %161 = vector.extract_strided_slice %140 {offsets = [3, 0], sizes = [1, 256], strides = [1, 1]} : vector<4x256xf32> to vector<1x256xf32>
    %162 = vector.broadcast %160 : vector<8x1xf32> to vector<8x256xf32>
    %163 = vector.broadcast %161 : vector<1x256xf32> to vector<8x256xf32>
    %164 = arith.mulf %162, %163 : vector<8x256xf32>
    %165 = arith.addf %159, %164 : vector<8x256xf32>
    %166 = arith.negf %165 : vector<8x256xf32>
    %167 = math.exp %166 : vector<8x256xf32>
    %cst_32 = arith.constant 1.000000e+00 : f32
    %168 = vector.broadcast %cst_32 : f32 to vector<8x256xf32>
    %169 = arith.addf %168, %167 : vector<8x256xf32>
    %170 = arith.divf %168, %169 : vector<8x256xf32>
    %171 = arith.mulf %165, %170 : vector<8x256xf32>
    %c1 = arith.constant 1 : index
    %c0_33 = arith.constant 0 : index
    %c0_34 = arith.constant 0 : index
    %172 = vector.load %arg5[%c1, %c0_33, %c0_34] : memref<2x8x256xf32, #tpu.memory_space<vmem>>, vector<1x8x256xf32>
    %173 = vector.shape_cast %172 : vector<1x8x256xf32> to vector<8x256xf32>
    %174 = vector.shape_cast %171 : vector<8x256xf32> to vector<1x8x256xf32>
    tpu.vector_store %arg5[%c1, %c0_33, %c0_34], %174 {strides = array<i32>} : memref<2x8x256xf32, #tpu.memory_space<vmem>>, vector<1x8x256xf32>,
    return
  }
  func.func @transform_0(%arg0: i32) -> (i32, i32, i32) {
    %c0_i32 = arith.constant 0 : i32
    %c0_i32_0 = arith.constant 0 : i32
    %c0_i32_1 = arith.constant 0 : i32
    return %arg0, %c0_i32, %c0_i32_0 : i32, i32, i32
  }
  func.func @transform_1(%arg0: i32) -> (i32, i32) {
    %c0_i32 = arith.constant 0 : i32
    %c0_i32_0 = arith.constant 0 : i32
    %c0_i32_1 = arith.constant 0 : i32
    return %c0_i32, %c0_i32_0 : i32, i32
  }
  func.func @transform_2(%arg0: i32) -> (i32, i32) {
    %c0_i32 = arith.constant 0 : i32
    %c0_i32_0 = arith.constant 0 : i32
    %c0_i32_1 = arith.constant 0 : i32
    return %c0_i32, %c0_i32_0 : i32, i32
  }
  func.func @transform_3(%arg0: i32) -> (i32, i32) {
    %c0_i32 = arith.constant 0 : i32
    %c0_i32_0 = arith.constant 0 : i32
    %c0_i32_1 = arith.constant 0 : i32
    return %c0_i32, %c0_i32_0 : i32, i32
  }
  func.func @transform_4(%arg0: i32) -> (i32, i32, i32) {
    %c0_i32 = arith.constant 0 : i32
    %c0_i32_0 = arith.constant 0 : i32
    %c0_i32_1 = arith.constant 0 : i32
    return %arg0, %c0_i32, %c0_i32_0 : i32, i32, i32
  }
}

</mosaic_0001>

<bundles_post_ra>
// kernel: tpu_custom_call.1
= control target key start
LH: loop header
LB: loop body
LE: loop exit
PB: predicated region body
PF: predicated region fallthrough
CT: control target
= control target key end

     0   :  { %vm26_vm0 = vcmask 1043456   ;;  %v83_v3 = vlaneseq  ;;  %v1186_v7 = vmov 0   ;;  %s1546_s0 = inlined_call_operand.vmem [shape: f32[2,4,256], index: 0, kind: input, shape index: {}]   ;;  %s1547_s1 = inlined_call_operand.vmem [shape: f32[16,16], index: 1, kind: input, shape index: {}]   ;;  %s1548_s2 = inlined_call_operand.vmem [shape: f32[25,4], index: 2, kind: input, shape index: {}]   ;;  %s1549_s3 = inlined_call_operand.vmem [shape: f32[34,1], index: 3, kind: input, shape index: {}]   ;;  %s1550_s4 = inlined_call_operand.hbm [shape: f32[2,8,256], index: 4, kind: output, shape index: {}]  }
   0x1   :  { %v1222_v0 = vld [vmem:[%s1546_s0 + $0x8] sm:$0xff]  ;;  %v1227_v1 = vld [vmem:[%s1546_s0] sm:$0xff]  ;;  %1088 = vset.pattern.permute.xlu1 %v1186_v7  ;;  %1089 = vset.pattern.permute.xlu0 %v1186_v7  ;;  %v1243_v12 = vld [vmem:[%s1549_s3 + $0x12] sm:$0xff] }
   0x2   :  { %v76_v2 = vld [vmem:[%s1549_s3 + $0x8] sm:$0x3]  ;;  %v23_v4 = vcombine.high %v1222_v0, %v1222_v0  ;;  %v32_v5 = vsel %vm26_vm0, %v1222_v0, 0.0  ;;  %v22_v6 = vcombine.high %v1227_v1, %v1227_v1  ;;  %v1237_v8 = vshrl.u32 %v83_v3, 7 }
   0x3   :  { %253 = vperm.xlu1 %1088, %v76_v2   ;;  %v27_v10 = vsel %vm26_vm0, %v1227_v1, 0.0 }
   0x4   :  { %v33_v9 = vsel %vm26_vm0, %v23_v4, 0.0  ;;  %v28_v11 = vsel %vm26_vm0, %v22_v6, 0.0 }
   0x5   :  { %9 = vsyncpa [#allocation3], 0  ;;  %v34_v13 = vadd.f32 %v33_v9, %v32_v5  ;;  %v1246_v14 = vsub.s32 1, %v1237_v8  ;;  %v29_v15 = vadd.f32 %v28_v11, %v27_v10  ;;  %v1251_v17 = vsub.s32 2, %v1237_v8  ;;  %v75_v20 = vld [vmem:[%s1549_s3] sm:$0xff] }
   0x6   :  { %v1256_v19 = vsub.s32 0, %v1237_v8  ;;  %v1264_v22 = vsub.s32 3, %v1237_v8  ;;  %v1187_v23 = vmov 1966171168   ;;  %v39_v31 = vld [vmem:[%s1547_s1] sm:$0xf] }
   0x7   :  { %35 = vadd.xlane.f32.xlu0 %v34_v13  ;;  %v483_v16 = vrot.slane %v1243_v12, %v1246_v14  ;;  %v490_v18 = vrot.slane %v1243_v12, %v1251_v17  ;;  %v81_v24 = vunpack.c.l.s4 %v1187_v23  ;;  %v1059_v27 = vld.sshfl [vmem:[%s1547_s1 + $0xe] sm:$0x11 pattern:$0x75316420]  ;;  %vm46_vm1 = vcmask 125952   ;;  %v42_v39 = vld [vmem:[%s1547_s1 + $0x6] sm:$0xff] }
   0x8   :  { %v476_v21 = vrot.slane %v1243_v12, %v1256_v19  ;;  %v1268_v25 = vrot.slane %v1243_v12, %v1264_v22  ;;  %v135_v29 = vcombine.high %v1059_v27, %v1059_v27  ;;  %v79_v43 = vcombine.high %v42_v39, %v42_v39  ;;  %v1057_v51 = vld [vmem:[%s1547_s1 + $0x4] ss:$0 sm:$0xff]  ;;  %v1058_v55 = vld [vmem:[%s1547_s1 + $0x5] ss:$0 sm:$0xff] }
   0x9   :  { %485 = vbcast.lane.b32.xlu1 %v483_v16, 256  ;;  %v82_v26 = vunpack.c.0.s8 %v81_v24  ;;  %vm203_vm2 = vcmask 1041409   ;;  %vm216_vm3 = vcmask 123904   ;;  %vm404_vm4 = vcmask 31744  }
   0xa   :  { %vm610_vm5 = vcmask 1042434   ;;  %vm612_vm6 = vcmask 1043459   ;;  %vm614_vm7 = vcmask 1044484   ;;  %vm616_vm8 = vcmask 1045509  }
   0xb   :  { %30 = vadd.xlane.f32.xlu0 %v29_v15  ;;  %v1275_v28 = vsub.s32 %v82_v26, %v1237_v8  ;;  %vm618_vm9 = vcmask 1046534   ;;  %vm620_vm10 = vcmask 1047559  }
   0xd   :  { %792 = vbcast.lane.b32.xlu1 %v483_v16, 511  ;;  %v1278_v30 = vrot.slane %v135_v29, %v1275_v28  ;;  %v93_v48 = vrot.slane %v79_v43, %v1275_v28  ;;  %v86_v54 = vrot.slane %v42_v39, %v1275_v28  ;;  %v142_v62 = vrot.slane %v1059_v27, %v1275_v28 }
   0xf   :  { %v95_v56 = vcombine.high %v93_v48, %v93_v48  ;;  %v94_v61 = vcombine.high %v86_v54, %v86_v54  ;;  %v102_v4 = vrot.slane %v86_v54, %v1275_v28  ;;  %v185_v7 = vrot.slane %v142_v62, %v1256_v19 }
  0x10   :  { %v189_v24 = vrot.slane %v1278_v30, %v1256_v19 }
  0x11   :  { %796 = vbcast.lane.b32.xlu1 %v490_v18, 511  ;;  %v123_v63 = vrot.slane %v95_v56, %v1275_v28  ;;  %v116_v6 = vrot.slane %v94_v61, %v1275_v28  ;;  %v153_v9 = vrot.slane %v102_v4, %v1256_v19  ;;  %v124_v16 = vcombine.high %v102_v4, %v102_v4 }
  0x13   :  { %v127_v10 = vcombine.high %v123_v63, %v123_v63  ;;  %v157_v15 = vrot.slane %v116_v6, %v1256_v19  ;;  %v126_v26 = vcombine.high %v116_v6, %v116_v6 }
  0x15   :  { %v181_v23 = vrot.slane %v127_v10, %v1256_v19 }
  0x21   :  { %249 = vperm.xlu0 %1089, %v75_v20  }
  0x25   :  { %478 = vbcast.lane.b32.xlu0 %v476_v21, 256 }
  0x29   :  { %788 = vbcast.lane.b32.xlu0 %v476_v21, 511 }
  0x2d   :  { %492 = vbcast.lane.b32.xlu0 %v490_v18, 256 }
  0x31   :  { %499 = vbcast.lane.b32.xlu0 %v1268_v25, 256 }
  0x94   :  { %v36_v32 = vpop.xlane.xlu0 %35 }
  0x95   :  { %v38_v33 = vmul.f32 0.00390625, %v36_v32  ;;  %v161_v32 = vrot.slane %v124_v16, %v1256_v19 }
  0x97   :  { %v45_v34 = vmul.f32 %v39_v31, %v38_v33 }
  0x98   :  { %v31_v35 = vpop.xlane.xlu0 %30 }
  0x99   :  { %v54_v36 = vsel %vm46_vm1, %v45_v34, 0.0  ;;  %v37_v37 = vmul.f32 0.00390625, %v31_v35  ;;  %v165_v35 = vrot.slane %v126_v26, %v1256_v19 }
  0x9a   :  { %v55_v38 = vrot.slane %v54_v36, 4 }
  0x9b   :  { %v44_v40 = vmul.f32 %v39_v31, %v37_v37 }
  0x9c   :  { %v56_v41 = vadd.f32 %v55_v38, %v54_v36  ;;  %v109_v36 = vrot.slane %v93_v48, %v1275_v28 }
  0x9d   :  { %v47_v42 = vsel %vm46_vm1, %v44_v40, 0.0 }
  0x9e   :  { %v57_v44 = vrot.slane %v56_v41, 2  ;;  %v48_v45 = vrot.slane %v47_v42, 4  ;;  %v125_v43 = vcombine.high %v109_v36, %v109_v36 }
  0xa0   :  { %v58_v46 = vadd.f32 %v57_v44, %v56_v41  ;;  %v49_v47 = vadd.f32 %v48_v45, %v47_v42  ;;  %v173_v42 = vrot.slane %v123_v63, %v1256_v19  ;;  %v177_v28 = vrot.slane %v125_v43, %v1256_v19 }
  0xa2   :  { %v59_v49 = vrot.slane %v58_v46, 1  ;;  %v50_v50 = vrot.slane %v49_v47, 2 }
  0xa4   :  { %v60_v52 = vadd.f32 %v59_v49, %v58_v46  ;;  %v51_v53 = vadd.f32 %v50_v50, %v49_v47  ;;  %v1331_v49 = vsub.s32 4, %v1237_v8 }
  0xa6   :  { %v66_v57 = vmul.f32 %v1057_v51, %v60_v52  ;;  %v52_v58 = vrot.slane %v51_v53, 1  ;;  %v504_v50 = vrot.slane %v1243_v12, %v1331_v49  ;;  %v169_v52 = vrot.slane %v109_v36, %v1256_v19 }
  0xa8   :  { %v1294_v59 = vadd.f32 %v1058_v55, %v66_v57  ;;  %v53_v60 = vadd.f32 %v52_v58, %v51_v53 }
  0xaa   :  { %v74_v2 = vmax.f32 %v1294_v59, 0.0  ;;  %v65_v3 = vmul.f32 %v1057_v51, %v53_v60  ;;  %v1336_v51 = vsub.s32 5, %v1237_v8 }
  0xac   :  { %v1300_v5 = vadd.f32 %v1058_v55, %v65_v3  ;;  %v202_v11 = vrot.slane %v74_v2, 7  ;;  %v511_v53 = vrot.slane %v1243_v12, %v1336_v51  ;;  %v254_v55 = vpop.permute.xlu1 %253 }
  0xad   :  { %v290_v60 = vrot.slane %v254_v55, %v1256_v19 }
  0xae   :  { %v73_v13 = vmax.f32 %v1300_v5, 0.0 }
  0xb0   :  { %v204_v18 = vsel %vm203_vm2, %v202_v11, %v73_v13  ;;  %v1342_v56 = vpop.permute.xlu1 %485 }
  0xb1   :  { %v214_v20 = vmul.f32 %v204_v18, %v185_v7  ;;  %v206_v21 = vmul.f32 %v204_v18, %v153_v9  ;;  %v207_v31 = vmul.f32 %v204_v18, %v157_v15  ;;  %v213_v33 = vmul.f32 %v204_v18, %v181_v23 }
  0xb2   :  { %v215_v34 = vmul.f32 %v204_v18, %v189_v24  ;;  %v208_v38 = vmul.f32 %v204_v18, %v161_v32  ;;  %v209_v41 = vmul.f32 %v204_v18, %v165_v35  ;;  %v211_v45 = vmul.f32 %v204_v18, %v173_v42 }
  0xb3   :  { %v241_v27 = vsel %vm216_vm3, %v214_v20, 0.0  ;;  %v217_v29 = vsel %vm216_vm3, %v206_v21, 0.0  ;;  %v220_v37 = vsel %vm216_vm3, %v207_v31, 0.0  ;;  %v238_v30 = vsel %vm216_vm3, %v213_v33, 0.0 }
  0xb4   :  { %242 = vadd.xlane.f32.xlu1 %v241_v27  ;;  %218 = vadd.xlane.f32.xlu0 %v217_v29  ;;  %v244_v39 = vsel %vm216_vm3, %v215_v34, 0.0  ;;  %v223_v40 = vsel %vm216_vm3, %v208_v38, 0.0  ;;  %v226_v44 = vsel %vm216_vm3, %v209_v41, 0.0  ;;  %v232_v46 = vsel %vm216_vm3, %v211_v45, 0.0  ;;  %v1344_v57 = vpop.permute.xlu1 %792 }
  0xb5   :  { %v212_v47 = vmul.f32 %v204_v18, %v177_v28  ;;  %v1350_v7 = vsub.s32 6, %v1237_v8  ;;  %v1357_v15 = vsub.s32 7, %v1237_v8  ;;  %v392_v20 = vrot.slane %v74_v2, %v1256_v19  ;;  %v1367_v8 = vpop.permute.xlu0 %249 }
  0xb6   :  { %v258_v2 = vrot.slane %v1367_v8, %v1256_v19  ;;  %v262_v31 = vrot.slane %v1367_v8, %v1246_v14  ;;  %v266_v34 = vrot.slane %v1367_v8, %v1251_v17 }
  0xb7   :  { %v235_v48 = vsel %vm216_vm3, %v212_v47, 0.0  ;;  %v518_v11 = vrot.slane %v1243_v12, %v1350_v7  ;;  %v525_v16 = vrot.slane %v1243_v12, %v1357_v15  ;;  %v274_v47 = vrot.slane %v1367_v8, %v1331_v49 }
  0xb8   :  { %221 = vadd.xlane.f32.xlu0 %v220_v37  ;;  %v1346_v58 = vpop.permute.xlu1 %796 }
  0xb9   :  { %v1369_v21 = vpop.permute.xlu0 %478 }
  0xbc   :  { %224 = vadd.xlane.f32.xlu0 %v223_v40  ;;  %v270_v40 = vrot.slane %v1367_v8, %v1264_v22 }
  0xbd   :  { %v1371_v23 = vpop.permute.xlu0 %788 }
  0xc0   :  { %227 = vadd.xlane.f32.xlu0 %v226_v44 }
  0xc1   :  { %v1373_v24 = vpop.permute.xlu0 %492 }
  0xc4   :  { %233 = vadd.xlane.f32.xlu0 %v232_v46 }
  0xc5   :  { %800 = vbcast.lane.b32.xlu1 %v1268_v25, 511  ;;  %v210_v25 = vmul.f32 %v204_v18, %v169_v52  ;;  %v381_v18 = vrot.slane %v73_v13, %v1256_v19  ;;  %v1375_v26 = vpop.permute.xlu0 %499  ;;  %v278_v52 = vrot.slane %v1367_v8, %v1336_v51 }
  0xc7   :  { %v229_v54 = vsel %vm216_vm3, %v210_v25, 0.0 }
  0xc8   :  { %236 = vadd.xlane.f32.xlu0 %v235_v48 }
  0xde   :  { %506 = vbcast.lane.b32.xlu0 %v504_v50, 256 }
  0xe2   :  { %513 = vbcast.lane.b32.xlu0 %v511_v53, 256 }
  0xe9   :  { %230 = vadd.xlane.f32.xlu1 %v229_v54 }
  0xfa   :  { %804 = vbcast.lane.b32.xlu1 %v504_v50, 511 }
  0xfe   :  { %808 = vbcast.lane.b32.xlu1 %v511_v53, 511 }
 0x122   :  { %239 = vadd.xlane.f32.xlu1 %v238_v30 }
 0x126   :  { %245 = vadd.xlane.f32.xlu1 %v244_v39  ;;  %v294_v39 = vrot.slane %v254_v55, %v1246_v14 }
 0x141   :  { %v243_v61 = vpop.xlane.xlu1 %242  ;;  %v219_v13 = vpop.xlane.xlu0 %218 }
 0x142   :  { %v313_v62 = vadd.f32 %v290_v60, %v243_v61  ;;  %v305_v33 = vadd.f32 %v258_v2, %v219_v13  ;;  %v282_v61 = vrot.slane %v1367_v8, %v1350_v7 }
 0x144   :  { %v1068_v63 = vmul.f32 -1.442695, %v313_v62  ;;  %v1060_v38 = vmul.f32 -1.442695, %v305_v33 }
 0x145   :  { %v1377_v5 = vpop.permute.xlu1 %800  ;;  %v222_v59 = vpop.xlane.xlu0 %221 }
 0x146   :  { %1098 = vpow2.f32 %v1068_v63  ;;  %v306_v36 = vadd.f32 %v262_v31, %v222_v59 }
 0x148   :  { %v1061_v41 = vmul.f32 -1.442695, %v306_v36 }
 0x149   :  { %v225_v35 = vpop.xlane.xlu0 %224 }
 0x14a   :  { %v307_v30 = vadd.f32 %v266_v34, %v225_v35 }
 0x14c   :  { %v1062_v45 = vmul.f32 -1.442695, %v307_v30 }
 0x14d   :  { %v228_v42 = vpop.xlane.xlu0 %227 }
 0x14e   :  { %v308_v28 = vadd.f32 %v270_v40, %v228_v42 }
 0x150   :  { %v1099_v3 = vpop.eup %1098  ;;  %v1063_v50 = vmul.f32 -1.442695, %v308_v28 }
 0x151   :  { %v366_v4 = vadd.f32 1.0, %v1099_v3  ;;  %v234_v53 = vpop.xlane.xlu0 %233 }
 0x152   :  { %v310_v55 = vadd.f32 %v278_v52, %v234_v53 }
 0x153   :  { %1100 = vrcp.f32 %v366_v4 }
 0x154   :  { %1102 = vpow2.f32 %v1060_v38 }
 0x155   :  { %1104 = vpow2.f32 %v1061_v41  ;;  %v237_v63 = vpop.xlane.xlu0 %236 }
 0x156   :  { %1106 = vpow2.f32 %v1062_v45 }
 0x15d   :  { %v1101_v6 = vpop.eup %1100 }
 0x15e   :  { %v458_v9 = vrot.slane %v1101_v6, %v1256_v19  ;;  %v771_v10 = vrot.slane %v1101_v6, %v1246_v14  ;;  %v1103_v54 = vpop.eup %1102  ;;  %v1065_v6 = vmul.f32 -1.442695, %v310_v55 }
 0x15f   :  { %v1105_v62 = vpop.eup %1104  ;;  %v339_v3 = vadd.f32 1.0, %v1103_v54 }
 0x160   :  { %461 = vbcast.lane.b32.xlu1 %v458_v9, 256  ;;  %775 = vbcast.lane.b32.xlu0 %v771_v10, 511  ;;  %v1107_v4 = vpop.eup %1106  ;;  %v340_v10 = vadd.f32 1.0, %v1105_v62 }
 0x164   :  { %812 = vbcast.lane.b32.xlu1 %v518_v11, 511  ;;  %520 = vbcast.lane.b32.xlu0 %v518_v11, 256  ;;  %v311_v11 = vadd.f32 %v282_v61, %v237_v63 }
 0x168   :  { %816 = vbcast.lane.b32.xlu1 %v525_v16, 511  ;;  %527 = vbcast.lane.b32.xlu0 %v525_v16, 256  ;;  %v1398_v16 = vpop.permute.xlu0 %506 }
 0x16c   :  { %387 = vbcast.lane.b32.xlu1 %v381_v18, 264  ;;  %383 = vbcast.lane.b32.xlu0 %v381_v18, 256  ;;  %v341_v18 = vadd.f32 1.0, %v1107_v4  ;;  %v1402_v31 = vpop.permute.xlu0 %513 }
 0x170   :  { %398 = vbcast.lane.b32.xlu1 %v392_v20, 264  ;;  %394 = vbcast.lane.b32.xlu0 %v392_v20, 256  ;;  %v286_v20 = vrot.slane %v1367_v8, %v1357_v15 }
 0x176   :  { %v231_v27 = vpop.xlane.xlu1 %230 }
 0x177   :  { %v309_v25 = vadd.f32 %v274_v47, %v231_v27  ;;  %v1066_v27 = vmul.f32 -1.442695, %v311_v11 }
 0x179   :  { %v1064_v60 = vmul.f32 -1.442695, %v309_v25 }
 0x17a   :  { %v1379_v29 = vpop.permute.xlu1 %804 }
 0x17e   :  { %v1385_v32 = vpop.permute.xlu1 %808 }
 0x1af   :  { %v240_v37 = vpop.xlane.xlu1 %239 }
 0x1b0   :  { %v312_v59 = vadd.f32 %v286_v20, %v240_v37 }
 0x1b2   :  { %v1067_v34 = vmul.f32 -1.442695, %v312_v59 }
 0x1b3   :  { %v246_v43 = vpop.xlane.xlu1 %245 }
 0x1b4   :  { %v314_v44 = vadd.f32 %v294_v39, %v246_v43 }
 0x1b6   :  { %v369_v46 = vsub.f32 %v314_v44, %v314_v44 }
 0x1b8   :  { %v370_v48 = vmul.f32 1.442695, %v369_v46 }
 0x1ba   :  { %1108 = vpow2.f32 %v370_v48 }
 0x1bb   :  { %1110 = vpow2.f32 %v1063_v50 }
 0x1bc   :  { %1112 = vpow2.f32 %v1064_v60 }
 0x1c4   :  { %v1109_v9 = vpop.eup %1108 }
 0x1c5   :  { %1114 = vrcp.f32 %v1109_v9  ;;  %v1111_v13 = vpop.eup %1110 }
 0x1c6   :  { %1116 = vrcp.f32 %v339_v3  ;;  %v342_v2 = vadd.f32 1.0, %v1111_v13  ;;  %v1113_v33 = vpop.eup %1112 }
 0x1c7   :  { %1118 = vpow2.f32 %v1065_v6  ;;  %v343_v38 = vadd.f32 1.0, %v1113_v33 }
 0x1c8   :  { %1120 = vrcp.f32 %v340_v10 }
 0x1c9   :  { %1122 = vrcp.f32 %v341_v18 }
 0x1ca   :  { %1124 = vpow2.f32 %v1066_v27 }
 0x1cb   :  { %1126 = vrcp.f32 %v342_v2 }
 0x1cc   :  { %1128 = vpow2.f32 %v1067_v34 }
 0x1cd   :  { %1130 = vrcp.f32 %v343_v38 }
 0x1cf   :  { %v1115_v35 = vpop.eup %1114 }
 0x1d0   :  { %v1117_v36 = vpop.eup %1116  ;;  %v1404_v30 = vmul.f32 %v1115_v35, %v1109_v9 }
 0x1d1   :  { %v1119_v39 = vpop.eup %1118 }
 0x1d2   :  { %v1121_v8 = vpop.eup %1120  ;;  %1076 = vpush %v1404_v30  ;;  %v1407_v40 = vpop.permute.xlu1 %461  ;;  %v758_v41 = vrot.slane %v1404_v30, 1  ;;  %v344_v44 = vadd.f32 1.0, %v1119_v39 }
 0x1d3   :  { %v1409_v37 = vpop.permute.xlu0 %775  ;;  %v464_v42 = vmul.f32 %v1117_v36, %v1407_v40  ;;  %v465_v43 = vmul.f32 %v1121_v8, %v1407_v40  ;;  %v1123_v46 = vpop.eup %1122 }
 0x1d4   :  { %1078 = vpush %v758_v41  ;;  %v779_v45 = vmul.f32 %v1121_v8, %v1409_v37  ;;  %v778_v28 = vmul.f32 %v1117_v36, %v1409_v37  ;;  %v1125_v50 = vpop.eup %1124  ;;  %v780_v52 = vmul.f32 %v1123_v46, %v1409_v37  ;;  %v466_v53 = vmul.f32 %v1123_v46, %v1407_v40 }
 0x1d5   :  { %v537_v47 = vmul.f32 %v1369_v21, %v464_v42  ;;  %v538_v48 = vmul.f32 %v1342_v56, %v465_v43  ;;  %1132 = vrcp.f32 %v344_v44  ;;  %v1127_v61 = vpop.eup %1126  ;;  %v345_v62 = vadd.f32 1.0, %v1125_v50 }
 0x1d6   :  { %v827_v55 = vmul.f32 %v1344_v57, %v779_v45  ;;  %v826_v60 = vmul.f32 %v1371_v23, %v778_v28  ;;  %v781_v56 = vmul.f32 %v1127_v61, %v1409_v37  ;;  %v467_v21 = vmul.f32 %v1127_v61, %v1407_v40  ;;  %v1129_v63 = vpop.eup %1128  ;;  %v813_v34 = vpop.permute.xlu1 %812 }
 0x1d7   :  { %v548_v25 = vrot.slane %v537_v47, %v1256_v19  ;;  %v552_v54 = vrot.slane %v538_v48, %v1256_v19  ;;  %v828_v6 = vmul.f32 %v1346_v58, %v780_v52  ;;  %v539_v57 = vmul.f32 %v1373_v24, %v466_v53  ;;  %v1131_v23 = vpop.eup %1130  ;;  %v521_v35 = vpop.permute.xlu0 %520 }
 0x1d8   :  { %v841_v3 = vrot.slane %v827_v55, %v1246_v14  ;;  %v837_v4 = vrot.slane %v826_v60, %v1246_v14  ;;  %1134 = vrcp.f32 %v345_v62  ;;  %v346_v9 = vadd.f32 1.0, %v1129_v63 }
 0x1d9   :  { %586 = vperm.xlu0 %1089, %v548_v25   ;;  %589 = vperm.xlu1 %1088, %v552_v54   ;;  %v829_v10 = vmul.f32 %v1377_v5, %v781_v56  ;;  %v540_v11 = vmul.f32 %v1375_v26, %v467_v21  ;;  %v845_v18 = vrot.slane %v828_v6, %v1246_v14  ;;  %v443_v56 = vld [vmem:[%s1549_s3 + $0x1a] sm:$0xff]  ;;  %v376_v6 = vld [vmem:[%s1548_s2 + $0x8] sm:$0xff] }
 0x1da   :  { %v556_v20 = vrot.slane %v539_v57, %v1256_v19  ;;  %v782_v13 = vmul.f32 %v1131_v23, %v1409_v37  ;;  %v468_v27 = vmul.f32 %v1131_v23, %v1407_v40  ;;  %1136 = vrcp.f32 %v346_v9  ;;  %v817_v47 = vpop.permute.xlu1 %816  ;;  %v375_v57 = vld [vmem:[%s1548_s2] sm:$0xff] }
 0x1db   :  { %v849_v24 = vrot.slane %v829_v10, %v1246_v14  ;;  %v560_v59 = vrot.slane %v540_v11, %v1256_v19  ;;  %v453_v28 = vrot.slane %v1404_v30, %v1256_v19  ;;  %v766_v53 = vrot.slane %v1404_v30, %v1246_v14 }
 0x1dc   :  { %v830_v5 = vmul.f32 %v1379_v29, %v782_v13  ;;  %v541_v26 = vmul.f32 %v1398_v16, %v468_v27 }
 0x1dd   :  { %878 = vperm.xlu1 %1088, %v841_v3   ;;  %875 = vperm.xlu0 %1089, %v837_v4  }
 0x1de   :  { %v853_v38 = vrot.slane %v830_v5, %v1246_v14  ;;  %v564_v39 = vrot.slane %v541_v26, %v1256_v19  ;;  %v388_v3 = vpop.permute.xlu1 %387 }
 0x1df   :  { %v1133_v58 = vpop.eup %1132  ;;  %v401_v10 = vmul.f32 %v388_v3, %v376_v6 }
 0x1e0   :  { %v783_v2 = vmul.f32 %v1133_v58, %v1409_v37  ;;  %v469_v33 = vmul.f32 %v1133_v58, %v1407_v40 }
 0x1e1   :  { %881 = vperm.xlu1 %1088, %v845_v18   ;;  %592 = vperm.xlu0 %1089, %v556_v20   ;;  %v406_v20 = vsel %vm404_vm4, %v401_v10, 0.0 }
 0x1e2   :  { %v1135_v36 = vpop.eup %1134  ;;  %v831_v8 = vmul.f32 %v1385_v32, %v783_v2  ;;  %v542_v41 = vmul.f32 %v1402_v31, %v469_v33  ;;  %v528_v32 = vpop.permute.xlu0 %527  ;;  %v441_v31 = vld [vmem:[%s1549_s3 + $0xa] sm:$0xff] }
 0x1e3   :  { %v784_v29 = vmul.f32 %v1135_v36, %v1409_v37  ;;  %v470_v16 = vmul.f32 %v1135_v36, %v1407_v40  ;;  %v454_v60 = vmul.f32 %v453_v28, %v441_v31  ;;  %v767_v62 = vmul.f32 %v766_v53, %v441_v31  ;;  %v399_v23 = vpop.permute.xlu1 %398 }
 0x1e4   :  { %v857_v44 = vrot.slane %v831_v8, %v1246_v14  ;;  %v568_v45 = vrot.slane %v542_v41, %v1256_v19  ;;  %v1137_v46 = vpop.eup %1136  ;;  %v403_v18 = vmul.f32 %v399_v23, %v376_v6 }
 0x1e5   :  { %884 = vperm.xlu1 %1088, %v849_v24   ;;  %595 = vperm.xlu0 %1089, %v560_v59   ;;  %v832_v42 = vmul.f32 %v813_v34, %v784_v29  ;;  %v543_v43 = vmul.f32 %v521_v35, %v470_v16  ;;  %v785_v48 = vmul.f32 %v1137_v46, %v1409_v37  ;;  %v1069_v29 = vld [vmem:[%s1548_s2 + $0x10] ss:$0 sm:$0xff] }
 0x1e6   :  { %v471_v50 = vmul.f32 %v1137_v46, %v1407_v40  ;;  %v629_v40 = vmul.f32 %v454_v60, %v1243_v12  ;;  %v912_v21 = vmul.f32 %v767_v62, %v1243_v12  ;;  %v384_v4 = vpop.permute.xlu0 %383  ;;  %v415_v27 = vsel %vm404_vm4, %v403_v18, 0.0 }
 0x1e7   :  { %v861_v52 = vrot.slane %v832_v42, %v1246_v14  ;;  %v572_v25 = vrot.slane %v543_v43, %v1256_v19  ;;  %v833_v54 = vmul.f32 %v817_v47, %v785_v48  ;;  %v400_v11 = vmul.f32 %v384_v4, %v375_v57  ;;  %v444_v4 = vld [vmem:[%s1548_s2 + $0x11] sm:$0xff]  ;;  %s1191_s2 = smov [#allocation2]  }
 0x1e8   :  { %v544_v55 = vmul.f32 %v528_v32, %v471_v50  ;;  %v630_v30 = vadd.f32 %v629_v40, %v443_v56  ;;  %v913_v63 = vadd.f32 %v912_v21, %v443_v56  ;;  %s1046_s20 = sshll.u32 %s1191_s2, 4  ;;  %s1047_s20 = int_to_ptr.vmem [resolvable:$true] %s1046_s20 }
 0x1e9   :  { %887 = vperm.xlu1 %1088, %v853_v38   ;;  %598 = vperm.xlu0 %1089, %v564_v39   ;;  %v865_v61 = vrot.slane %v833_v54, %v1246_v14  ;;  %v405_v13 = vsel %vm404_vm4, %v400_v11, 0.0  ;;  %s1162_s0 = scalar_lea.vmem %s1047_s20, 512  ;;  %p1167_p1 = scmp.lt.s32.totalorder %s1047_s20, %s1047_s20 }
 0x1ea   :  { %v576_v37 = vrot.slane %v544_v55, %v1256_v19  ;;  %v395_v9 = vpop.permute.xlu0 %394  ;;  %v407_v24 = vadd.f32 %v406_v20, %v405_v13  ;;  %p1163_p0 = scmp.ne.s32.totalorder %s1047_s20, %s1162_s0  ;;  %p1168_p2 = scmp.lt.s32.totalorder %s1162_s0, %s1162_s0 }
 0x1eb   :  { %v402_v12 = vmul.f32 %v395_v9, %v375_v57 }
 0x1ec   :  { %v408_v5 = vrot.slane %v407_v24, 4  ;;  %p1169_p3 = por %p1168_p2, %p1167_p1 }
 0x1ed   :  { %890 = vperm.xlu1 %1088, %v857_v44   ;;  %601 = vperm.xlu0 %1089, %v568_v45   ;;  %v414_v58 = vsel %vm404_vm4, %v402_v12, 0.0 }
 0x1ee   :  { %v416_v59 = vadd.f32 %v415_v27, %v414_v58  ;;  %v409_v2 = vadd.f32 %v408_v5, %v407_v24  ;;  %p1170_p4 = pnand %p1169_p3, %p1163_p0 }
 0x1f0   :  { %v417_v26 = vrot.slane %v416_v59, 4  ;;  %v410_v34 = vrot.slane %v409_v2, 2 }
 0x1f1   :  { %893 = vperm.xlu1 %1088, %v861_v52   ;;  %604 = vperm.xlu0 %1089, %v572_v25  }
 0x1f2   :  { %v418_v33 = vadd.f32 %v417_v26, %v416_v59  ;;  %v411_v36 = vadd.f32 %v410_v34, %v409_v2 }
 0x1f4   :  { %v419_v35 = vrot.slane %v418_v33, 2  ;;  %v412_v39 = vrot.slane %v411_v36, 1 }
 0x1f5   :  { %896 = vperm.xlu1 %1088, %v865_v61   ;;  %607 = vperm.xlu0 %1089, %v576_v37  }
 0x1f6   :  { %v420_v38 = vadd.f32 %v419_v35, %v418_v33  ;;  %v413_v41 = vadd.f32 %v412_v39, %v411_v36 }
 0x1f8   :  { %v421_v8 = vrot.slane %v420_v38, 1  ;;  %v427_v42 = vadd.f32 %v1069_v29, %v413_v41  ;;  %v1188_v41 = vmov 1  }
 0x1f9   :  { %658 = vperm.xlu0 %1089, %v630_v30  }
 0x1fa   :  { %v422_v16 = vadd.f32 %v421_v8, %v420_v38  ;;  %v1070_v44 = vmul.f32 -1.442695, %v427_v42 }
 0x1fc   :  { %v428_v43 = vadd.f32 %v1069_v29, %v422_v16  ;;  %1138 = vpow2.f32 %v1070_v44  ;;  %v1189_v29 = vmov 2   ;;  %v1190_v16 = vmov 3  }
 0x1fd   :  { %941 = vperm.xlu0 %1089, %v913_v63  }
 0x1fe   :  { %v1071_v45 = vmul.f32 -1.442695, %v428_v43 }
 0x200   :  { %1140 = vpow2.f32 %v1071_v45  ;;  %v922_v45 = vrot.slane %v1222_v0, %v1256_v19 }
 0x203   :  { %s1077_s16 = spop %1076 }
 0x204   :  { %v447_v6 = vstv %s1077_s16 }
 0x205   :  { %s1079_s17 = spop %1078  ;;  %v449_v27 = vmul.f32 %v447_v6, %v444_v4 }
 0x206   :  { %v1139_v50 = vpop.eup %1138  ;;  %v760_v57 = vstv %s1079_s17 }
 0x207   :  { %v435_v53 = vadd.f32 1.0, %v1139_v50  ;;  %v762_v58 = vmul.f32 %v760_v57, %v444_v4  ;;  %v670_v50 = vrot.slane %v1227_v1, %v1246_v14  ;;  %v696_v57 = vrot.slane %v1227_v1, %v1251_v17 }
 0x209   :  { %1142 = vrcp.f32 %v435_v53  ;;  %v932_v53 = vrot.slane %v922_v45, %v1256_v19 }
 0x20a   :  { %v1141_v52 = vpop.eup %1140 }
 0x20b   :  { %v436_v55 = vadd.f32 1.0, %v1141_v52  ;;  %v674_v52 = vrot.slane %v1227_v1, %v1336_v51 }
 0x20d   :  { %1144 = vrcp.f32 %v436_v55 }
 0x213   :  { %v1143_v10 = vpop.eup %1142 }
 0x214   :  { %v627_v36 = vrot.slane %v1143_v10, %v1256_v19 }
 0x217   :  { %v1145_v12 = vpop.eup %1144 }
 0x218   :  { %v910_v35 = vrot.slane %v1145_v12, %v1256_v19 }
 0x258   :  { %v590_v28 = vpop.permute.xlu1 %589  ;;  %v587_v46 = vpop.permute.xlu0 %586 }
 0x259   :  { %v609_v62 = vsel %vm203_vm2, %v590_v28, %v587_v46  ;;  %v926_v28 = vrot.slane %v1222_v0, %v1331_v49  ;;  %v639_v46 = vrot.slane %v1227_v1, %v1256_v19 }
 0x25c   :  { %v879_v47 = vpop.permute.xlu1 %878  ;;  %v876_v32 = vpop.permute.xlu0 %875 }
 0x25d   :  { %v898_v56 = vsel %vm203_vm2, %v879_v47, %v876_v32  ;;  %v643_v47 = vrot.slane %v1227_v1, %v1331_v49  ;;  %v649_v49 = vrot.slane %v639_v46, %v1256_v19 }
 0x25f   :  { %v653_v55 = vrot.slane %v643_v47, %v1256_v19 }
 0x260   :  { %v882_v31 = vpop.permute.xlu1 %881  ;;  %v593_v48 = vpop.permute.xlu0 %592 }
 0x261   :  { %v899_v30 = vsel %vm610_vm5, %v882_v31, %v898_v56  ;;  %v611_v21 = vsel %vm610_vm5, %v593_v48, %v609_v62  ;;  %v953_v31 = vrot.slane %v1222_v0, %v1246_v14  ;;  %v957_v48 = vrot.slane %v1222_v0, %v1336_v51 }
 0x262   :  { %v680_v51 = vrot.slane %v670_v50, %v1246_v14  ;;  %v684_v62 = vrot.slane %v674_v52, %v1246_v14 }
 0x264   :  { %v885_v25 = vpop.permute.xlu1 %884  ;;  %v596_v54 = vpop.permute.xlu0 %595 }
 0x265   :  { %v900_v23 = vsel %vm612_vm6, %v885_v25, %v899_v30  ;;  %v613_v9 = vsel %vm612_vm6, %v596_v54, %v611_v21  ;;  %v936_v25 = vrot.slane %v926_v28, %v1256_v19  ;;  %v1005_v19 = vrot.slane %v1222_v0, %v1264_v22 }
 0x268   :  { %v888_v60 = vpop.permute.xlu1 %887  ;;  %v599_v61 = vpop.permute.xlu0 %598 }
 0x269   :  { %v901_v11 = vsel %vm614_vm7, %v888_v60, %v900_v23  ;;  %v615_v18 = vsel %vm614_vm7, %v599_v61, %v613_v9  ;;  %v963_v60 = vrot.slane %v953_v31, %v1246_v14  ;;  %v967_v61 = vrot.slane %v957_v48, %v1246_v14 }
 0x26a   :  { %v700_v23 = vrot.slane %v1227_v1, %v1350_v7 }
 0x26c   :  { %v891_v37 = vpop.permute.xlu1 %890  ;;  %v602_v40 = vpop.permute.xlu0 %601 }
 0x26d   :  { %v902_v20 = vsel %vm616_vm8, %v891_v37, %v901_v11  ;;  %v617_v13 = vsel %vm616_vm8, %v602_v40, %v615_v18  ;;  %v979_v37 = vrot.slane %v1222_v0, %v1251_v17  ;;  %v983_v40 = vrot.slane %v1222_v0, %v1350_v7 }
 0x26f   :  { %v989_v10 = vrot.slane %v979_v37, %v1251_v17  ;;  %v993_v11 = vrot.slane %v983_v40, %v1251_v17 }
 0x270   :  { %v894_v63 = vpop.permute.xlu1 %893  ;;  %v605_v3 = vpop.permute.xlu0 %604 }
 0x271   :  { %v903_v24 = vsel %vm618_vm9, %v894_v63, %v902_v20  ;;  %v619_v59 = vsel %vm618_vm9, %v605_v3, %v617_v13  ;;  %v1009_v3 = vrot.slane %v1222_v0, %v1357_v15  ;;  %v722_v20 = vrot.slane %v1227_v1, %v1264_v22 }
 0x272   :  { %v726_v0 = vrot.slane %v1227_v1, %v1357_v15 }
 0x273   :  { %v1019_v7 = vrot.slane %v1009_v3, %v1264_v22  ;;  %v732_v15 = vrot.slane %v722_v20, %v1264_v22 }
 0x274   :  { %v897_v5 = vpop.permute.xlu1 %896  ;;  %v608_v26 = vpop.permute.xlu0 %607 }
 0x275   :  { %v904_v2 = vsel %vm620_vm10, %v897_v5, %v903_v24  ;;  %v621_v33 = vsel %vm620_vm10, %v608_v26, %v619_v59  ;;  %v706_v5 = vrot.slane %v696_v57, %v1251_v17  ;;  %v710_v26 = vrot.slane %v700_v23, %v1251_v17 }
 0x276   :  { %v906_v34 = vmul.f32 %v904_v2, %v762_v58  ;;  %v623_v38 = vmul.f32 %v621_v33, %v449_v27  ;;  %v1015_v58 = vrot.slane %v1005_v19, %v1264_v22 }
 0x278   :  { %v911_v39 = vmul.f32 %v910_v35, %v906_v34  ;;  %v628_v8 = vmul.f32 %v627_v36, %v623_v38  ;;  %v659_v42 = vpop.permute.xlu0 %658 }
 0x27a   :  { %916 = vperm.xlu1 %1088, %v911_v39   ;;  %633 = vperm.xlu0 %1089, %v628_v8  }
 0x27c   :  { %v942_v43 = vpop.permute.xlu0 %941 }
 0x27e   :  { %1090 = vset.pattern.permute.xlu1 %v1188_v41  ;;  %1091 = vset.pattern.permute.xlu0 %v1189_v29 }
 0x27f   :  { %664 = vperm.xlu1 %1090, %v628_v8   ;;  %690 = vperm.xlu0 %1091, %v628_v8  }
 0x283   :  { %947 = vperm.xlu1 %1090, %v911_v39   ;;  %1094 = vset.pattern.permute.xlu0 %v1190_v16 }
 0x284   :  { %999 = vperm.xlu0 %1094, %v911_v39  }
 0x287   :  { %1092 = vset.pattern.permute.xlu1 %v1189_v29 }
 0x288   :  { %973 = vperm.xlu1 %1092, %v911_v39  }
 0x28c   :  { %1093 = vset.pattern.permute.xlu1 %v1190_v16 }
 0x28d   :  { %716 = vperm.xlu1 %1093, %v628_v8   ;;  %v736_v8 = vrot.slane %v726_v0, %v1264_v22 }
 0x2f9   :  { %v917_v44 = vpop.permute.xlu1 %916  ;;  %v634_v32 = vpop.permute.xlu0 %633 }
 0x2fa   :  { %v937_v30 = vmul.f32 %v932_v53, %v917_v44  ;;  %v938_v21 = vmul.f32 %v936_v25, %v917_v44  ;;  %v654_v4 = vmul.f32 %v649_v49, %v634_v32  ;;  %v655_v6 = vmul.f32 %v653_v55, %v634_v32 }
 0x2fc   :  { %v944_v13 = vadd.f32 %v942_v43, %v937_v30  ;;  %v945_v27 = vadd.f32 %v942_v43, %v938_v21  ;;  %v661_v24 = vadd.f32 %v659_v42, %v654_v4  ;;  %v662_v59 = vadd.f32 %v659_v42, %v655_v6 }
 0x2fe   :  { %v665_v54 = vpop.permute.xlu1 %664  ;;  %v691_v56 = vpop.permute.xlu0 %690 }
 0x2ff   :  { %v685_v18 = vmul.f32 %v680_v51, %v665_v54  ;;  %v686_v12 = vmul.f32 %v684_v62, %v665_v54  ;;  %v711_v43 = vmul.f32 %v706_v5, %v691_v56  ;;  %v712_v44 = vmul.f32 %v710_v26, %v691_v56 }
 0x301   :  { %v687_v39 = vadd.f32 %v685_v18, %v661_v24  ;;  %v688_v1 = vadd.f32 %v686_v12, %v662_v59 }
 0x302   :  { %v948_v63 = vpop.permute.xlu1 %947 }
 0x303   :  { %v968_v9 = vmul.f32 %v963_v60, %v948_v63  ;;  %v969_v14 = vmul.f32 %v967_v61, %v948_v63  ;;  %v1000_v2 = vpop.permute.xlu0 %999  ;;  %v713_v46 = vadd.f32 %v711_v43, %v687_v39  ;;  %v714_v47 = vadd.f32 %v712_v44, %v688_v1 }
 0x304   :  { %v1020_v41 = vmul.f32 %v1015_v58, %v1000_v2  ;;  %v1021_v29 = vmul.f32 %v1019_v7, %v1000_v2 }
 0x305   :  { %v970_v34 = vadd.f32 %v968_v9, %v944_v13  ;;  %v971_v35 = vadd.f32 %v969_v14, %v945_v27 }
 0x307   :  { %v974_v33 = vpop.permute.xlu1 %973 }
 0x308   :  { %v994_v36 = vmul.f32 %v989_v10, %v974_v33  ;;  %v995_v38 = vmul.f32 %v993_v11, %v974_v33 }
 0x30a   :  { %v996_v16 = vadd.f32 %v994_v36, %v970_v34  ;;  %v997_v42 = vadd.f32 %v995_v38, %v971_v35 }
 0x30c   :  { %v1022_v45 = vadd.f32 %v1020_v41, %v996_v16  ;;  %v1023_v17 = vadd.f32 %v1021_v29, %v997_v42  ;;  %v717_v28 = vpop.permute.xlu1 %716 }
 0x30d   :  { %v737_v32 = vmul.f32 %v732_v15, %v717_v28  ;;  %v738_v31 = vmul.f32 %v736_v8, %v717_v28 }
 0x30e   :  { %v1074_v48 = vmul.f32 -1.442695, %v1022_v45  ;;  %v1075_v50 = vmul.f32 -1.442695, %v1023_v17 }
 0x30f   :  { %v739_v52 = vadd.f32 %v737_v32, %v713_v46  ;;  %v740_v53 = vadd.f32 %v738_v31, %v714_v47 }
 0x310   :  { %1146 = vpow2.f32 %v1074_v48 }
 0x311   :  { %1148 = vpow2.f32 %v1075_v50  ;;  %v1072_v22 = vmul.f32 -1.442695, %v739_v52  ;;  %v1073_v25 = vmul.f32 -1.442695, %v740_v53 }
 0x313   :  { %1150 = vpow2.f32 %v1072_v22 }
 0x314   :  { %1152 = vpow2.f32 %v1073_v25 }
 0x31a   :  { %v1147_v54 = vpop.eup %1146 }
 0x31b   :  { %v1149_v49 = vpop.eup %1148  ;;  %v1030_v55 = vadd.f32 1.0, %v1147_v54 }
 0x31c   :  { %v1031_v60 = vadd.f32 1.0, %v1149_v49 }
 0x31d   :  { %v1151_v61 = vpop.eup %1150  ;;  %1154 = vrcp.f32 %v1030_v55 }
 0x31e   :  { %v1153_v37 = vpop.eup %1152  ;;  %1156 = vrcp.f32 %v1031_v60  ;;  %v747_v40 = vadd.f32 1.0, %v1151_v61 }
 0x31f   :  { %v748_v51 = vadd.f32 1.0, %v1153_v37 }
 0x320   :  { %1158 = vrcp.f32 %v747_v40 }
 0x321   :  { %1160 = vrcp.f32 %v748_v51 }
 0x327   :  { %v1155_v62 = vpop.eup %1154 }
 0x328   :  { %v1157_v56 = vpop.eup %1156  ;;  %v1036_v30 = vmul.f32 %v1155_v62, %v1022_v45 }
 0x329   :  { %v1037_v21 = vmul.f32 %v1157_v56, %v1023_v17 }
 0x32a   :  { %v1159_v63 = vpop.eup %1158  ;;  %1039 = vst [vmem:[#allocation2 + $0x10] sm:$0xff] %v1036_v30 }
 0x32b   :  { %v1161_v19 = vpop.eup %1160  ;;  %1040 = vst [vmem:[#allocation2 + $0x18] sm:$0xff] %v1037_v21  ;;  %v753_v3 = vmul.f32 %v1159_v63, %v739_v52 }
 0x32c   :  { %v754_v4 = vmul.f32 %v1161_v19, %v740_v53 }
 0x32d   :  { %755 = vst [vmem:[#allocation2] sm:$0xff] %v753_v3 }
 0x32e   :  { %756 = vst [vmem:[#allocation2 + $0x8] sm:$0xff] %v754_v4 }
 0x32f   :  { %1173 = shalt.err (!%p1170_p4)
}
 0x330   :  { %s1174_s23 = scalar_lea.hbm %s1550_s4, 512 }
 0x331   :  { %p1175_p5 = scmp.ne.s32.totalorder %s1550_s4, %s1174_s23  ;;  %p1178_p6 = scmp.lt.u32.totalorder %s1174_s23, %s1550_s4 }
 0x333   :  { %p1180_p7 = pnand %p1178_p6, %p1175_p5 }
 0x335   :  { %1183 = shalt.err (!%p1180_p7)
}
 0x336   :  { %s1192_s28 = smov 256   ;;  %s1193_s29 = smov 16  }
 0x337   :  { %1052 = dma.vmem_to_hbm [thread:$0]  %s1047_s20, 512, %s1550_s4, [#allocation3], %s1192_s28, %s1192_s28, %s1193_s29  }
 0x338   :  { %1184 = dma.done.wait [#allocation3], 512  }
 0x339   :  { %1185 = vsyncadd [#allocation3], 4294966784 }
 0x33a   :  { %1056 = vsyncpa [#allocation3], 1 }

</bundles_post_ra>
